<compile_context>
chip_gen: v6e
topology: v6e:2x2x1
jax: 0.10.0
libtpu: 0.0.40
codegen_flags: <defaults>
</compile_context>

<pallas_src>
import functools

import jax
import jax.numpy as jnp
from jax.experimental import pallas as pl
from jax.experimental.pallas import tpu as pltpu


def _vmem_capacity_bytes():
    try:
        return int(pltpu.get_tpu_info().vmem_capacity_bytes)
    except Exception:
        return 64 * 1024 * 1024  # conservative default (v7x per-TensorCore)


def _seq_sum_kernel(zi_ref, zj_ref, zi_sum_ref, zj_sum_ref, *, seq_len,
                    tiles_per_chunk):
    """Accumulate per-chunk sequence sums of both views into (1, B, D) f32."""
    c = pl.program_id(0)        # chunk (parallel across TensorCores on v7x)
    t = pl.program_id(1)        # sequence tile within the chunk (reduction)

    @pl.when(t == 0)
    def _init():
        zi_sum_ref[...] = jnp.zeros_like(zi_sum_ref)
        zj_sum_ref[...] = jnp.zeros_like(zj_sum_ref)

    ts = zi_ref.shape[1]
    start = (c * tiles_per_chunk + t) * ts
    # Mask tail rows of the last (possibly partial / phantom) tile.  Out-of-range
    # rows hold unspecified data; masking to zero makes them contribute nothing.
    valid = (jax.lax.broadcasted_iota(jnp.int32, (1, ts, 1), 1) + start) < seq_len

    zi = jnp.where(valid, zi_ref[...].astype(jnp.float32), 0.0)
    zj = jnp.where(valid, zj_ref[...].astype(jnp.float32), 0.0)

    zi_sum_ref[...] += jnp.sum(zi, axis=1)[None, :, :]
    zj_sum_ref[...] += jnp.sum(zj, axis=1)[None, :, :]


def _loss_kernel(zi_sums_ref, zj_sums_ref, out_ref, *, temperature, seq_len,
                 mxu_dtype):
    """Mean -> L2-normalize -> similarity -> per-row NT-Xent loss (2, B)."""
    inv_s = jnp.float32(1.0 / seq_len)
    zi_m = jnp.sum(zi_sums_ref[...], axis=0) * inv_s          # (B, D) mean over S
    zj_m = jnp.sum(zj_sums_ref[...], axis=0) * inv_s

    # F.normalize(., dim=1): v / max(||v||, eps)  ==  v * rsqrt(max(||v||^2, eps^2))
    zi_n = zi_m * jax.lax.rsqrt(
        jnp.maximum(jnp.sum(zi_m * zi_m, axis=1, keepdims=True), jnp.float32(1e-24)))
    zj_n = zj_m * jax.lax.rsqrt(
        jnp.maximum(jnp.sum(zj_m * zj_m, axis=1, keepdims=True), jnp.float32(1e-24)))

    inv_t = jnp.float32(1.0 / temperature)
    # Fold 1/temperature into the LHS so the MXU emits logits directly.
    a_i = (zi_n * inv_t).astype(mxu_dtype)
    a_j = (zj_n * inv_t).astype(mxu_dtype)
    b_cat = jnp.concatenate([zi_n, zj_n], axis=0).astype(mxu_dtype)   # (2B, D)

    dims = (((1,), (1,)), ((), ()))
    l_i = jax.lax.dot_general(a_i, b_cat, dims, preferred_element_type=jnp.float32)
    l_j = jax.lax.dot_general(a_j, b_cat, dims, preferred_element_type=jnp.float32)
    # l_i, l_j: (B, 2B).  Columns [0, B) come from view i, [B, 2B) from view j.

    b, n = l_i.shape
    row = jax.lax.broadcasted_iota(jnp.int32, (b, n), 0)
    col = jax.lax.broadcasted_iota(jnp.int32, (b, n), 1)

    # Positive logits pulled from the SAME matmul output that feeds the LSE,
    # so f32/bf16 MXU operands stay numerically consistent.
    pos_i = jnp.sum(jnp.where(col == row + b, l_i, 0.0), axis=1, keepdims=True)
    pos_j = jnp.sum(jnp.where(col == row, l_j, 0.0), axis=1, keepdims=True)

    neg_big = jnp.float32(-1e30)
    l_i = jnp.where(col == row, neg_big, l_i)        # mask self-sim (view-i rows)
    l_j = jnp.where(col == row + b, neg_big, l_j)    # mask self-sim (view-j rows)

    # TODO(synk): for very large B, tile this phase over (B_tile, 2B) blocks with
    # an online (flash-style) logsumexp instead of whole (B, 2B) blocks.
    def row_lse(x):
        m = jnp.max(x, axis=1, keepdims=True)
        return jnp.log(jnp.sum(jnp.exp(x - m), axis=1, keepdims=True)) + m

    losses = jnp.concatenate([row_lse(l_i) - pos_i,
                              row_lse(l_j) - pos_j], axis=1)   # (B, 2)
    out_ref[...] = losses.T                                    # (2, B) lane-dense


def contrastive_loss(z_i, z_j, temperature=0.1, *, seq_tile=None,
                     mxu_dtype=jnp.float32, num_chunks=2, interpret=False):
    """Pallas implementation of ContrastiveLoss.forward(z_i, z_j) -> scalar."""
    assert z_i.shape == z_j.shape and z_i.ndim == 3
    B, S, D = z_i.shape
    itemsize = jnp.dtype(z_i.dtype).itemsize

    # Per-generation VMEM sizing (v7x: 64 MiB per TC, v5e/v6e: 128 MiB).
    vmem_cap = _vmem_capacity_bytes()
    vmem_limit = int(vmem_cap * 0.85)
    input_budget = int(vmem_cap * 0.55)          # 2 views x 2 pipeline buffers

    ts = (input_budget // max(1, 4 * B * D * itemsize)) if seq_tile is None \
        else int(seq_tile)
    if ts >= S:
        ts = S                                   # block dim == array dim: always legal
    else:
        ts = max(16, (ts // 16) * 16)            # (16,128)-safe for bf16 and f32

    num_tiles = pl.cdiv(S, ts)
    chunks = max(1, min(int(num_chunks), num_tiles))
    tiles_per_chunk = pl.cdiv(num_tiles, chunks)

    def in_map(c, t):
        # Clamp phantom tiles (c*tpc + t >= num_tiles) to an in-bounds DMA; their
        # rows are fully masked to zero in-kernel.
        return (0, jnp.minimum(c * tiles_per_chunk + t, num_tiles - 1), 0)

    sum_kernel = functools.partial(_seq_sum_kernel, seq_len=S,
                                   tiles_per_chunk=tiles_per_chunk)

    zi_sums, zj_sums = pl.pallas_call(
        sum_kernel,
        out_shape=(jax.ShapeDtypeStruct((chunks, B, D), jnp.float32),
                   jax.ShapeDtypeStruct((chunks, B, D), jnp.float32)),
        grid_spec=pltpu.PrefetchScalarGridSpec(
            num_scalar_prefetch=0,
            grid=(chunks, tiles_per_chunk),
            in_specs=[pl.BlockSpec((B, ts, D), in_map),
                      pl.BlockSpec((B, ts, D), in_map)],
            out_specs=[pl.BlockSpec((1, B, D), lambda c, t: (c, 0, 0)),
                       pl.BlockSpec((1, B, D), lambda c, t: (c, 0, 0))]),
        compiler_params=pltpu.CompilerParams(
            dimension_semantics=("parallel", "arbitrary"),
            vmem_limit_bytes=vmem_limit),
        interpret=interpret,
    )(z_i, z_j)

    loss_kernel = functools.partial(_loss_kernel, temperature=float(temperature),
                                    seq_len=S, mxu_dtype=mxu_dtype)

    per_row = pl.pallas_call(
        loss_kernel,
        out_shape=jax.ShapeDtypeStruct((2, B), jnp.float32),
        grid_spec=pltpu.PrefetchScalarGridSpec(
            num_scalar_prefetch=0,
            grid=(1,),
            in_specs=[pl.BlockSpec((chunks, B, D), lambda i: (0, 0, 0)),
                      pl.BlockSpec((chunks, B, D), lambda i: (0, 0, 0))],
            out_specs=pl.BlockSpec((2, B), lambda i: (0, 0))),
        compiler_params=pltpu.CompilerParams(
            dimension_semantics=("arbitrary",),
            vmem_limit_bytes=vmem_limit),
        interpret=interpret,
    )(zi_sums, zj_sums)

    # Mean over all 2B rows (per-row losses kept for a future backward kernel).
    return jnp.sum(per_row) / jnp.float32(2 * B)


def _reference_loss(z_i, z_j, temperature=0.1):
    """Pure-JAX reference mirroring the PyTorch module (sanity check)."""
    zi = jnp.mean(z_i.astype(jnp.float32), axis=1)
    zj = jnp.mean(z_j.astype(jnp.float32), axis=1)
    z = jnp.concatenate([zi, zj], axis=0)
    z = z / jnp.maximum(jnp.linalg.norm(z, axis=1, keepdims=True), 1e-12)
    sim = z @ z.T
    B = zi.shape[0]
    n = 2 * B
    idx = jnp.arange(n)
    partner = jnp.where(idx < B, idx + B, idx - B)
    logits = sim / temperature
    pos = logits[idx, partner]
    masked = jnp.where(jnp.eye(n, dtype=bool), -jnp.inf, logits)
    lse = jax.scipy.special.logsumexp(masked, axis=1)
    return jnp.mean(lse - pos)


if __name__ == "__main__":
    key = jax.random.PRNGKey(0)
    k1, k2, k3, k4, k5, k6 = jax.random.split(key, 6)

    # Case 1: shapes implied by the module (batch=2, seq=8, hidden=32), auto tile.
    B, S, D = 2, 8, 32
    z_i = jax.random.normal(k1, (B, S, D), dtype=jnp.float32)
    z_j = jax.random.normal(k2, (B, S, D), dtype=jnp.float32)
    loss = contrastive_loss(z_i, z_j, temperature=0.1)
    jax.block_until_ready(loss)
    ref = _reference_loss(z_i, z_j, temperature=0.1)
    assert jnp.allclose(loss, ref, atol=1e-4, rtol=1e-4), (loss, ref)

    # Case 2: unaligned S/D, forced small tile -> 2 chunks x 1 tile, tail masking.
    B2, S2, D2 = 4, 25, 96
    z_i2 = jax.random.normal(k3, (B2, S2, D2), dtype=jnp.float32)
    z_j2 = jax.random.normal(k4, (B2, S2, D2), dtype=jnp.float32)
    loss2 = contrastive_loss(z_i2, z_j2, temperature=0.1, seq_tile=16)
    jax.block_until_ready(loss2)
    ref2 = _reference_loss(z_i2, z_j2, temperature=0.1)
    assert jnp.allclose(loss2, ref2, atol=1e-4, rtol=1e-4), (loss2, ref2)

    # Case 3: odd tile count -> phantom (fully-masked, index-clamped) tile in chunk 1.
    B3, S3, D3 = 4, 40, 96
    z_i3 = jax.random.normal(k5, (B3, S3, D3), dtype=jnp.float32)
    z_j3 = jax.random.normal(k6, (B3, S3, D3), dtype=jnp.float32)
    loss3 = contrastive_loss(z_i3, z_j3, temperature=0.1, seq_tile=16)
    jax.block_until_ready(loss3)
    ref3 = _reference_loss(z_i3, z_j3, temperature=0.1)
    assert jnp.allclose(loss3, ref3, atol=1e-4, rtol=1e-4), (loss3, ref3)

    # Case 4: bf16 inputs streamed from HBM (half the bytes) + bf16 MXU operands,
    # f32 accumulation; validated against the f32 reference on the same bf16 data.
    z_i4 = z_i2.astype(jnp.bfloat16)
    z_j4 = z_j2.astype(jnp.bfloat16)
    loss4 = contrastive_loss(z_i4, z_j4, temperature=0.1, seq_tile=16,
                             mxu_dtype=jnp.bfloat16)
    jax.block_until_ready(loss4)
    ref4 = _reference_loss(z_i4.astype(jnp.float32), z_j4.astype(jnp.float32), 0.1)
    assert jnp.isfinite(loss4) and abs(float(loss4) - float(ref4)) < 0.15, (loss4, ref4)

    print("KERNEL_OK")
</pallas_src>

<mosaic_0001>
module attributes {stable_mosaic.version = 11 : i64} {
  func.func @_seq_sum_kernel(%arg0: i32, %arg1: i32, %arg2: memref<2x8x32xf32, #tpu.memory_space<vmem>>, %arg3: memref<2x8x32xf32, #tpu.memory_space<vmem>>, %arg4: memref<1x2x32xf32, #tpu.memory_space<vmem>>, %arg5: memref<1x2x32xf32, #tpu.memory_space<vmem>>) attributes {dimension_semantics = [#tpu.dimension_semantics<parallel>, #tpu.dimension_semantics<arbitrary>], iteration_bounds = array<i64: 1, 1>, scalar_prefetch = 0 : i64, scratch_operands = 0 : i64, tpu.core_type = #tpu.core_type<tc>, window_params = [{transform_indices = @transform_0, window_bounds = array<i64: 2, 8, 32>}, {transform_indices = @transform_1, window_bounds = array<i64: 2, 8, 32>}, {transform_indices = @transform_2, window_bounds = array<i64: 1, 2, 32>}, {transform_indices = @transform_3, window_bounds = array<i64: 1, 2, 32>}]} {
    %c0_i32 = arith.constant 0 : i32
    %0 = arith.cmpi eq, %arg1, %c0_i32 : i32
    %1 = arith.extui %0 : i1 to i32
    %c0_i32_0 = arith.constant 0 : i32
    %2 = arith.cmpi ne, %1, %c0_i32_0 : i32
    scf.if %2 {
      %cst_22 = arith.constant 0.000000e+00 : f32
      %31 = vector.broadcast %cst_22 : f32 to vector<1x2x32xf32>
      %c0_23 = arith.constant 0 : index
      %c0_24 = arith.constant 0 : index
      %c0_25 = arith.constant 0 : index
      %32 = vector.load %arg4[%c0_23, %c0_24, %c0_25] : memref<1x2x32xf32, #tpu.memory_space<vmem>>, vector<1x2x32xf32>
      tpu.vector_store %arg4[%c0_23, %c0_24, %c0_25], %31 {strides = array<i32>} : memref<1x2x32xf32, #tpu.memory_space<vmem>>, vector<1x2x32xf32>,
      %cst_26 = arith.constant 0.000000e+00 : f32
      %33 = vector.broadcast %cst_26 : f32 to vector<1x2x32xf32>
      %c0_27 = arith.constant 0 : index
      %c0_28 = arith.constant 0 : index
      %c0_29 = arith.constant 0 : index
      %34 = vector.load %arg5[%c0_27, %c0_28, %c0_29] : memref<1x2x32xf32, #tpu.memory_space<vmem>>, vector<1x2x32xf32>
      tpu.vector_store %arg5[%c0_27, %c0_28, %c0_29], %33 {strides = array<i32>} : memref<1x2x32xf32, #tpu.memory_space<vmem>>, vector<1x2x32xf32>,
    } else {
    }
    %c1_i32 = arith.constant 1 : i32
    %3 = arith.muli %arg0, %c1_i32 : i32
    %4 = arith.addi %3, %arg1 : i32
    %c8_i32 = arith.constant 8 : i32
    %5 = arith.muli %4, %c8_i32 : i32
    %6 = tpu.iota {dimensions = array<i32: 1>} : vector<1x8x1xi32>
    %7 = vector.broadcast %5 : i32 to vector<1x8x1xi32>
    %8 = arith.addi %6, %7 : vector<1x8x1xi32>
    %c8_i32_1 = arith.constant 8 : i32
    %9 = vector.broadcast %c8_i32_1 : i32 to vector<1x8x1xi32>
    %10 = arith.cmpi slt, %8, %9 : vector<1x8x1xi32>
    %c0 = arith.constant 0 : index
    %c0_2 = arith.constant 0 : index
    %c0_3 = arith.constant 0 : index
    %11 = vector.load %arg2[%c0, %c0_2, %c0_3] : memref<2x8x32xf32, #tpu.memory_space<vmem>>, vector<2x8x32xf32>
    %cst = arith.constant 0.000000e+00 : f32
    %12 = vector.shape_cast %10 : vector<1x8x1xi1> to vector<1x8x1xi1>
    %13 = vector.broadcast %12 : vector<1x8x1xi1> to vector<2x8x32xi1>
    %14 = vector.broadcast %cst : f32 to vector<2x8x32xf32>
    %15 = arith.select %13, %11, %14 : vector<2x8x32xi1>, vector<2x8x32xf32>
    %c0_4 = arith.constant 0 : index
    %c0_5 = arith.constant 0 : index
    %c0_6 = arith.constant 0 : index
    %16 = vector.load %arg3[%c0_4, %c0_5, %c0_6] : memref<2x8x32xf32, #tpu.memory_space<vmem>>, vector<2x8x32xf32>
    %cst_7 = arith.constant 0.000000e+00 : f32
    %17 = vector.shape_cast %10 : vector<1x8x1xi1> to vector<1x8x1xi1>
    %18 = vector.broadcast %17 : vector<1x8x1xi1> to vector<2x8x32xi1>
    %19 = vector.broadcast %cst_7 : f32 to vector<2x8x32xf32>
    %20 = arith.select %18, %16, %19 : vector<2x8x32xi1>, vector<2x8x32xf32>
    %c0_8 = arith.constant 0 : index
    %c0_9 = arith.constant 0 : index
    %c0_10 = arith.constant 0 : index
    %21 = vector.load %arg4[%c0_8, %c0_9, %c0_10] : memref<1x2x32xf32, #tpu.memory_space<vmem>>, vector<1x2x32xf32>
    %cst_11 = arith.constant dense<0.000000e+00> : vector<2x32xf32>
    %22 = vector.multi_reduction <add>, %15, %cst_11 [1] : vector<2x8x32xf32> to vector<2x32xf32>
    %23 = vector.shape_cast %22 : vector<2x32xf32> to vector<1x2x32xf32>
    %24 = arith.addf %21, %23 : vector<1x2x32xf32>
    %c0_12 = arith.constant 0 : index
    %c0_13 = arith.constant 0 : index
    %c0_14 = arith.constant 0 : index
    %25 = vector.load %arg4[%c0_12, %c0_13, %c0_14] : memref<1x2x32xf32, #tpu.memory_space<vmem>>, vector<1x2x32xf32>
    tpu.vector_store %arg4[%c0_12, %c0_13, %c0_14], %24 {strides = array<i32>} : memref<1x2x32xf32, #tpu.memory_space<vmem>>, vector<1x2x32xf32>,
    %c0_15 = arith.constant 0 : index
    %c0_16 = arith.constant 0 : index
    %c0_17 = arith.constant 0 : index
    %26 = vector.load %arg5[%c0_15, %c0_16, %c0_17] : memref<1x2x32xf32, #tpu.memory_space<vmem>>, vector<1x2x32xf32>
    %cst_18 = arith.constant dense<0.000000e+00> : vector<2x32xf32>
    %27 = vector.multi_reduction <add>, %20, %cst_18 [1] : vector<2x8x32xf32> to vector<2x32xf32>
    %28 = vector.shape_cast %27 : vector<2x32xf32> to vector<1x2x32xf32>
    %29 = arith.addf %26, %28 : vector<1x2x32xf32>
    %c0_19 = arith.constant 0 : index
    %c0_20 = arith.constant 0 : index
    %c0_21 = arith.constant 0 : index
    %30 = vector.load %arg5[%c0_19, %c0_20, %c0_21] : memref<1x2x32xf32, #tpu.memory_space<vmem>>, vector<1x2x32xf32>
    tpu.vector_store %arg5[%c0_19, %c0_20, %c0_21], %29 {strides = array<i32>} : memref<1x2x32xf32, #tpu.memory_space<vmem>>, vector<1x2x32xf32>,
    return
  }
  func.func @transform_0(%arg0: i32, %arg1: i32) -> (i32, i32, i32) {
    %c1_i32 = arith.constant 1 : i32
    %0 = arith.muli %arg0, %c1_i32 : i32
    %1 = arith.addi %0, %arg1 : i32
    %c0_i32 = arith.constant 0 : i32
    %2 = arith.minsi %1, %c0_i32 : i32
    %c0_i32_0 = arith.constant 0 : i32
    %c0_i32_1 = arith.constant 0 : i32
    %c0_i32_2 = arith.constant 0 : i32
    return %c0_i32_0, %2, %c0_i32_1 : i32, i32, i32
  }
  func.func @transform_1(%arg0: i32, %arg1: i32) -> (i32, i32, i32) {
    %c1_i32 = arith.constant 1 : i32
    %0 = arith.muli %arg0, %c1_i32 : i32
    %1 = arith.addi %0, %arg1 : i32
    %c0_i32 = arith.constant 0 : i32
    %2 = arith.minsi %1, %c0_i32 : i32
    %c0_i32_0 = arith.constant 0 : i32
    %c0_i32_1 = arith.constant 0 : i32
    %c0_i32_2 = arith.constant 0 : i32
    return %c0_i32_0, %2, %c0_i32_1 : i32, i32, i32
  }
  func.func @transform_2(%arg0: i32, %arg1: i32) -> (i32, i32, i32) {
    %c0_i32 = arith.constant 0 : i32
    %c0_i32_0 = arith.constant 0 : i32
    %c0_i32_1 = arith.constant 0 : i32
    return %arg0, %c0_i32, %c0_i32_0 : i32, i32, i32
  }
  func.func @transform_3(%arg0: i32, %arg1: i32) -> (i32, i32, i32) {
    %c0_i32 = arith.constant 0 : i32
    %c0_i32_0 = arith.constant 0 : i32
    %c0_i32_1 = arith.constant 0 : i32
    return %arg0, %c0_i32, %c0_i32_0 : i32, i32, i32
  }
}

</mosaic_0001>

<bundles_post_ra>
// kernel: tpu_custom_call.1
= control target key start
LH: loop header
LB: loop body
LE: loop exit
PB: predicated region body
PF: predicated region fallthrough
CT: control target
= control target key end

     0   :  { %9 = vsyncpa [#allocation3], 0  ;;  %s300_s0 = inlined_call_operand.hbm [shape: f32[2,8,32], index: 0, kind: input, shape index: {}]   ;;  %s301_s1 = inlined_call_operand.hbm [shape: f32[2,8,32], index: 1, kind: input, shape index: {}]   ;;  %s302_s2 = inlined_call_operand.hbm [shape: f32[1,2,32], index: 2, kind: output, shape index: {0}]   ;;  %s303_s3 = inlined_call_operand.hbm [shape: f32[1,2,32], index: 3, kind: output, shape index: {1}]  }
   0x1   :  { %10 = vsyncpa [#allocation6], 0 }
   0x2   :  { %11 = vsyncpa [#allocation4], 0 }
   0x3   :  { %12 = vsyncpa [#allocation9], 0  ;;  %s257_s12 = smov [#allocation2]  }
   0x4   :  { %s23_s13 = sshll.u32 %s257_s12, 4  ;;  %s24_s13 = int_to_ptr.vmem [resolvable:$true] %s23_s13 }
   0x5   :  { %s177_s14 = scalar_lea.vmem %s24_s13, 256  ;;  %p182_p1 = scmp.lt.s32.totalorder %s24_s13, %s24_s13 }
   0x6   :  { %p178_p0 = scmp.ne.s32.totalorder %s24_s13, %s177_s14  ;;  %p183_p2 = scmp.lt.s32.totalorder %s177_s14, %s177_s14 }
   0x8   :  { %p184_p3 = por %p183_p2, %p182_p1 }
   0xa   :  { %p185_p4 = pnand %p184_p3, %p178_p0 }
   0xc   :  { %188 = shalt.err (!%p185_p4)
}
   0xd   :  { %s258_s15 = smov 128   ;;  %s259_s16 = smov 8  }
   0xe   :  { %29 = dma.hbm_to_vmem [thread:$0]  %s300_s0, 256, %s24_s13, [#allocation3], %s258_s15, %s258_s15, %s259_s16  }
   0xf   :  { %s260_s19 = smov [#allocation5]  }
  0x10   :  { %s40_s20 = sshll.u32 %s260_s19, 4  ;;  %s41_s20 = int_to_ptr.vmem [resolvable:$true] %s40_s20 }
  0x11   :  { %s197_s21 = scalar_lea.vmem %s41_s20, 256  ;;  %p202_p6 = scmp.lt.s32.totalorder %s41_s20, %s41_s20 }
  0x12   :  { %p198_p5 = scmp.ne.s32.totalorder %s41_s20, %s197_s21  ;;  %p203_p7 = scmp.lt.s32.totalorder %s197_s21, %s197_s21 }
  0x14   :  { %p204_p8 = por %p203_p7, %p202_p6 }
  0x16   :  { %p205_p9 = pnand %p204_p8, %p198_p5 }
  0x18   :  { %208 = shalt.err (!%p205_p9)
}
  0x19   :  { %46 = dma.hbm_to_vmem [thread:$0]  %s301_s1, 256, %s41_s20, [#allocation6], %s258_s15, %s258_s15, %s259_s16  }
  0x1a   :  { %249 = dma.done.wait [#allocation3], 256  }
  0x1b   :  { %250 = vsyncadd [#allocation3], 4294967040 }
  0x1c   :  { %251 = dma.done.wait [#allocation6], 256  }
  0x1d   :  { %252 = vsyncadd [#allocation6], 4294967040  ;;  %vm63_vm0 = vcmask 254976   ;;  %v261_v0 = vmov 0.0   ;;  %vm84_vm1 = vcmask 261120   ;;  %v73_v1 = vld [vmem:[#allocation2] sm:$0xff] }
  0x1e   :  { %64 = vst.msk [vmem:[#allocation7] sm:$0x3] %vm63_vm0, %v261_v0  ;;  %65 = vst.msk [vmem:[#allocation8] sm:$0x3] %vm63_vm0, %v261_v0  ;;  %v74_v2 = vld [vmem:[#allocation2 + $0x8] sm:$0xff]  ;;  %v79_v3 = vld [vmem:[#allocation5] sm:$0xff] }
  0x1f   :  { %v85_v4 = vsel %vm84_vm1, %v73_v1, 0.0  ;;  %v92_v5 = vsel %vm84_vm1, %v74_v2, 0.0  ;;  %v80_v6 = vld [vmem:[#allocation5 + $0x8] sm:$0xff]  ;;  %v108_v7 = vsel %vm84_vm1, %v79_v3, 0.0  ;;  %vm101_vm2 = vcmask 1041409   ;;  %s262_s0 = smov [#allocation7]  }
  0x20   :  { %v86_v8 = vrot.slane %v85_v4, 4  ;;  %v93_v9 = vrot.slane %v92_v5, 4  ;;  %v109_v10 = vrot.slane %v108_v7, 4  ;;  %v115_v11 = vsel %vm84_vm1, %v80_v6, 0.0  ;;  %s134_s1 = sshll.u32 %s262_s0, 4  ;;  %s263_s24 = smov [#allocation8]   ;;  %s135_s1 = int_to_ptr.vmem [resolvable:$true] %s134_s1 }
  0x21   :  { %v116_v12 = vrot.slane %v115_v11, 4  ;;  %s144_s25 = sshll.u32 %s263_s24, 4  ;;  %s209_s26 = scalar_lea.vmem %s135_s1, 32  ;;  %s145_s25 = int_to_ptr.vmem [resolvable:$true] %s144_s25 }
  0x22   :  { %v87_v13 = vadd.f32 %v86_v8, %v85_v4  ;;  %v94_v14 = vadd.f32 %v93_v9, %v92_v5  ;;  %v110_v15 = vadd.f32 %v109_v10, %v108_v7  ;;  %p210_p10 = scmp.ne.s32.totalorder %s135_s1, %s209_s26  ;;  %p214_p11 = scmp.lt.s32.totalorder %s135_s1, %s135_s1 }
  0x23   :  { %v117_v16 = vadd.f32 %v116_v12, %v115_v11  ;;  %p215_p12 = scmp.lt.s32.totalorder %s209_s26, %s209_s26 }
  0x24   :  { %v88_v17 = vrot.slane %v87_v13, 2  ;;  %v95_v18 = vrot.slane %v94_v14, 2  ;;  %v111_v19 = vrot.slane %v110_v15, 2 }
  0x25   :  { %v118_v20 = vrot.slane %v117_v16, 2  ;;  %v83_v29 = vld [vmem:[#allocation7] sm:$0x3]  ;;  %v107_v33 = vld [vmem:[#allocation8] sm:$0x3]  ;;  %p216_p13 = por %p215_p12, %p214_p11 }
  0x26   :  { %v89_v21 = vadd.f32 %v88_v17, %v87_v13  ;;  %v96_v22 = vadd.f32 %v95_v18, %v94_v14  ;;  %v112_v23 = vadd.f32 %v111_v19, %v110_v15 }
  0x27   :  { %v119_v24 = vadd.f32 %v118_v20, %v117_v16  ;;  %p217_p0 = pnand %p216_p13, %p210_p10 }
  0x28   :  { %v90_v25 = vrot.slane %v89_v21, 1  ;;  %v97_v26 = vrot.slane %v96_v22, 1  ;;  %v113_v27 = vrot.slane %v112_v23, 1 }
  0x29   :  { %v120_v28 = vrot.slane %v119_v24, 1 }
  0x2a   :  { %v91_v30 = vadd.f32 %v90_v25, %v89_v21  ;;  %v98_v31 = vadd.f32 %v97_v26, %v96_v22  ;;  %v114_v32 = vadd.f32 %v113_v27, %v112_v23 }
  0x2b   :  { %v121_v34 = vadd.f32 %v120_v28, %v119_v24 }
  0x2c   :  { %v102_v35 = vsel %vm101_vm2, %v98_v31, %v91_v30 }
  0x2d   :  { %v104_v36 = vadd.f32 %v102_v35, %v83_v29  ;;  %v124_v37 = vsel %vm101_vm2, %v121_v34, %v114_v32 }
  0x2e   :  { %v126_v38 = vadd.f32 %v124_v37, %v107_v33 }
  0x2f   :  { %106 = vst.msk [vmem:[#allocation7] sm:$0x3] %vm63_vm0, %v104_v36 }
  0x30   :  { %127 = vst.msk [vmem:[#allocation8] sm:$0x3] %vm63_vm0, %v126_v38 }
  0x31   :  { %220 = shalt.err (!%p217_p0)
}
  0x32   :  { %137 = dma.vmem_to_hbm [thread:$0]  %s135_s1, 32, %s302_s2, [#allocation4]  }
  0x33   :  { %s229_s29 = scalar_lea.vmem %s145_s25, 32  ;;  %p234_p2 = scmp.lt.s32.totalorder %s145_s25, %s145_s25 }
  0x34   :  { %p230_p1 = scmp.ne.s32.totalorder %s145_s25, %s229_s29  ;;  %p235_p3 = scmp.lt.s32.totalorder %s229_s29, %s229_s29 }
  0x36   :  { %p236_p4 = por %p235_p3, %p234_p2 }
  0x38   :  { %p237_p5 = pnand %p236_p4, %p230_p1 }
  0x3a   :  { %240 = shalt.err (!%p237_p5)
}
  0x3b   :  { %147 = dma.vmem_to_hbm [thread:$0]  %s145_s25, 32, %s303_s3, [#allocation9]  }
  0x3c   :  { %253 = dma.done.wait [#allocation4], 32  }
  0x3d   :  { %254 = vsyncadd [#allocation4], 4294967264 }
  0x3e   :  { %255 = dma.done.wait [#allocation9], 32  }
  0x3f   :  { %256 = vsyncadd [#allocation9], 4294967264 }
  0x40   :  { %154 = vsyncpa [#allocation3], 1 }
  0x41   :  { %155 = vsyncpa [#allocation6], 1 }
  0x42   :  { %156 = vsyncpa [#allocation4], 1 }
  0x43   :  { %157 = vsyncpa [#allocation9], 1 }

</bundles_post_ra>
